<compile_context>
chip_gen: v7x
topology: tpu7x:2x2x1
jax: 0.10.0
libtpu: 0.0.40
codegen_flags: <defaults>
</compile_context>

<pallas_src>
import functools

import jax
import jax.numpy as jnp
from jax.experimental import pallas as pl
from jax.experimental.pallas import tpu as pltpu

VOCAB_SIZE = 65   # len(chars) in the reference module
N_EMBD = 72
BLOCK_SIZE = 48


def _round_up(x, m):
    return (x + m - 1) // m * m


def embedder_kernel(ids_ref, table_ref, out_ref, *, seq_len, vocab_size):
    # ids_ref   : (TM, 1)     int32    flattened token ids (row r = b*T + t)
    # table_ref : (K_PAD, D)  float32  [tok_table ; pos_table ; zero pad] rows
    # out_ref   : (TM, D)     float32  tok_emb + pos_emb
    tm = out_ref.shape[0]
    k_pad = table_ref.shape[0]

    tok = ids_ref[...]                                              # (TM, 1)

    # Reconstruct the position index in-kernel: r = row0 + i, t = r % T.
    row0 = pl.program_id(0) * tm
    col = jax.lax.broadcasted_iota(jnp.int32, (tm, k_pad), 1)       # lane idx
    row = jax.lax.broadcasted_iota(jnp.int32, (tm, k_pad), 0) + row0
    pos = vocab_size + row % seq_len                                 # (TM, K_PAD)

    # "Two-hot" selector: picks the token row and the position row, so one
    # MXU matmul produces tok_emb + pos_emb in a single pass.
    sel = jnp.logical_or(col == tok, col == pos)
    one_hot = sel.astype(jnp.float32)                                # (TM, K_PAD)

    # HIGHEST keeps the one-hot gather bit-exact vs an f32 table lookup.
    out_ref[...] = jnp.dot(
        one_hot, table_ref[...],
        preferred_element_type=jnp.float32,
        precision=jax.lax.Precision.HIGHEST)


def _embed_impl(idx, table, *, vocab_size, emb_dim, max_seq, tm_cap):
    B, T = idx.shape
    assert T <= max_seq, f"sequence length {T} exceeds block_size {max_seq}"
    K_PAD = table.shape[0]

    M = B * T
    M8 = _round_up(M, 8)
    # Row-block size: big blocks amortize per-step pipeline overhead, but keep
    # >= 2 grid blocks whenever possible so "parallel" can shard across v7x's
    # two TensorCores.
    if M8 >= 16:
        TM = min(tm_cap, max(8, (M8 // 16) * 8))
    else:
        TM = M8
    M_pad = _round_up(M8, TM)

    tok_ids = idx.astype(jnp.int32).reshape(M, 1)
    if M_pad != M:
        tok_ids = jnp.pad(tok_ids, ((0, M_pad - M), (0, 0)))  # pad rows discarded

    kernel = functools.partial(embedder_kernel, seq_len=T, vocab_size=vocab_size)

    out2d = pl.pallas_call(
        kernel,
        out_shape=jax.ShapeDtypeStruct((M_pad, emb_dim), jnp.float32),
        grid=(M_pad // TM,),
        in_specs=[
            pl.BlockSpec((TM, 1), lambda i: (i, 0)),
            # Grid-invariant block (constant index_map): not re-DMA'd per step.
            pl.BlockSpec((K_PAD, emb_dim), lambda i: (0, 0)),
        ],
        # Emit D=72 lanes directly (full array dim) — no post-kernel lane slice.
        out_specs=pl.BlockSpec((TM, emb_dim), lambda i: (i, 0)),
        compiler_params=pltpu.CompilerParams(
            dimension_semantics=("parallel",)),
    )(tok_ids, table)

    out2d = out2d if M_pad == M else out2d[:M]
    return out2d.reshape(B, T, emb_dim)   # major-dim split: pure metadata op


def make_embedder(tok_table, pos_table, *, tm_cap=512):
    """Build the fused embedder once; returns a jitted function of `idx`.

    The combined padded table is constructed here (init time), so per-call
    work is just the Pallas call plus a tiny index reshape.
    """
    V, D = tok_table.shape
    BS = pos_table.shape[0]
    K = V + BS
    K_PAD = _round_up(K, 128)   # MXU contraction dim -> full 128 lanes

    table = jnp.zeros((K_PAD, D), jnp.float32)
    table = table.at[:V].set(tok_table.astype(jnp.float32))
    table = table.at[V:K].set(pos_table.astype(jnp.float32))
    table = jax.block_until_ready(table)

    # TODO(synk): for vocabularies beyond ~16-32k the dense one-hot matmul is
    # O(M*V) and the full-table VMEM block stops fitting (earliest on v7x's
    # 64 MiB VMEM); switch the table to memory_space=pl.ANY with a
    # scalar-prefetch / pl.Element row-gather DMA at that point.

    @jax.jit
    def embed(idx):
        return _embed_impl(idx, table, vocab_size=V, emb_dim=D,
                           max_seq=BS, tm_cap=tm_cap)

    return embed


def embedder_ref(idx, tok_table, pos_table):
    # Pure-JAX reference of the PyTorch forward.
    T = idx.shape[1]
    return tok_table[idx] + pos_table[:T][None, :, :]


if __name__ == "__main__":
    key = jax.random.PRNGKey(0)
    k_tok, k_pos, k_idx = jax.random.split(key, 3)

    # nn.Embedding default init: N(0, 1)
    tok_table = jax.random.normal(k_tok, (VOCAB_SIZE, N_EMBD), dtype=jnp.float32)
    pos_table = jax.random.normal(k_pos, (BLOCK_SIZE, N_EMBD), dtype=jnp.float32)

    # Small example consistent with the module: B=2, T=8 (T <= block_size=48).
    B, T = 2, 8
    idx = jax.random.randint(k_idx, (B, T), 0, VOCAB_SIZE, dtype=jnp.int32)

    embed = make_embedder(tok_table, pos_table)
    out = jax.block_until_ready(embed(idx))
    ref = embedder_ref(idx, tok_table, pos_table)

    assert out.shape == (B, T, N_EMBD), out.shape
    assert out.dtype == jnp.float32
    assert jnp.allclose(out, ref, atol=1e-5, rtol=1e-5), "mismatch vs reference"

    print("KERNEL_OK")
</pallas_src>

<mosaic_0001>
module attributes {stable_mosaic.version = 11 : i64} {
  func.func @embedder_kernel(%arg0: i32, %arg1: memref<8x1xi32, #tpu.memory_space<vmem>>, %arg2: memref<128x72xf32, #tpu.memory_space<vmem>>, %arg3: memref<8x72xf32, #tpu.memory_space<vmem>>) attributes {dimension_semantics = [#tpu.dimension_semantics<parallel>], iteration_bounds = array<i64: 2>, scalar_prefetch = 0 : i64, scratch_operands = 0 : i64, tpu.core_type = #tpu.core_type<tc>, window_params = [{transform_indices = @transform_0, window_bounds = array<i64: 8, 1>}, {pipeline_mode = #tpu.pipeline_mode<synchronous>, transform_indices = @transform_1, window_bounds = array<i64: 128, 72>}, {transform_indices = @transform_2, window_bounds = array<i64: 8, 72>}]} {
    %c0 = arith.constant 0 : index
    %c0_0 = arith.constant 0 : index
    %0 = vector.load %arg1[%c0, %c0_0] : memref<8x1xi32, #tpu.memory_space<vmem>>, vector<8x1xi32>
    %c8_i32 = arith.constant 8 : i32
    %1 = arith.muli %arg0, %c8_i32 : i32
    %2 = tpu.iota {dimensions = array<i32: 1>} : vector<8x128xi32>
    %3 = tpu.iota {dimensions = array<i32: 0>} : vector<8x128xi32>
    %4 = vector.broadcast %1 : i32 to vector<8x128xi32>
    %5 = arith.addi %3, %4 : vector<8x128xi32>
    %c8_i32_1 = arith.constant 8 : i32
    %c0_i32 = arith.constant 0 : i32
    %6 = arith.cmpi eq, %c8_i32_1, %c0_i32 : i32
    %c1_i32 = arith.constant 1 : i32
    %7 = arith.select %6, %c1_i32, %c8_i32_1 : i32
    %8 = vector.broadcast %7 : i32 to vector<8x128xi32>
    %9 = arith.remsi %5, %8 : vector<8x128xi32>
    %c0_i32_2 = arith.constant 0 : i32
    %10 = vector.broadcast %c0_i32_2 : i32 to vector<8x128xi32>
    %11 = arith.cmpi ne, %9, %10 : vector<8x128xi32>
    %c0_i32_3 = arith.constant 0 : i32
    %12 = vector.broadcast %c0_i32_3 : i32 to vector<8x128xi32>
    %13 = arith.cmpi slt, %9, %12 : vector<8x128xi32>
    %c0_i32_4 = arith.constant 0 : i32
    %14 = arith.cmpi slt, %7, %c0_i32_4 : i32
    %15 = vector.broadcast %14 : i1 to vector<8x128xi1>
    %16 = vector.broadcast %15 : vector<8x128xi1> to vector<8x128xi1>
    %17 = arith.xori %13, %16 : vector<8x128xi1>
    %18 = arith.andi %17, %11 : vector<8x128xi1>
    %19 = vector.broadcast %7 : i32 to vector<8x128xi32>
    %20 = arith.addi %9, %19 : vector<8x128xi32>
    %21 = arith.select %18, %20, %9 : vector<8x128xi1>, vector<8x128xi32>
    %c65_i32 = arith.constant 65 : i32
    %22 = vector.broadcast %c65_i32 : i32 to vector<8x128xi32>
    %23 = arith.addi %22, %21 : vector<8x128xi32>
    %24 = vector.broadcast %0 : vector<8x1xi32> to vector<8x128xi32>
    %25 = arith.cmpi eq, %2, %24 : vector<8x128xi32>
    %26 = arith.cmpi eq, %2, %23 : vector<8x128xi32>
    %27 = arith.ori %25, %26 : vector<8x128xi1>
    %28 = arith.extui %27 : vector<8x128xi1> to vector<8x128xi32>
    %29 = arith.sitofp %28 : vector<8x128xi32> to vector<8x128xf32>
    %c0_5 = arith.constant 0 : index
    %c0_6 = arith.constant 0 : index
    %30 = vector.load %arg2[%c0_5, %c0_6] : memref<128x72xf32, #tpu.memory_space<vmem>>, vector<128x72xf32>
    %cst = arith.constant dense<0.000000e+00> : vector<8x72xf32>
    %31 = tpu.matmul %29, %30, %cst {dimension_numbers = #tpu.dot_dimension_numbers<[1], [0], [0], [1], [0, 0, 1, 1], [], []>, precision = #tpu.contract_precision<fp32>} : vector<8x128xf32>, vector<128x72xf32>, vector<8x72xf32> -> vector<8x72xf32>
    %c0_7 = arith.constant 0 : index
    %c0_8 = arith.constant 0 : index
    %32 = vector.load %arg3[%c0_7, %c0_8] : memref<8x72xf32, #tpu.memory_space<vmem>>, vector<8x72xf32>
    tpu.vector_store %arg3[%c0_7, %c0_8], %31 {strides = array<i32>} : memref<8x72xf32, #tpu.memory_space<vmem>>, vector<8x72xf32>,
    return
  }
  func.func @transform_0(%arg0: i32) -> (i32, i32) {
    %c0_i32 = arith.constant 0 : i32
    %c0_i32_0 = arith.constant 0 : i32
    return %arg0, %c0_i32 : i32, i32
  }
  func.func @transform_1(%arg0: i32) -> (i32, i32) {
    %c0_i32 = arith.constant 0 : i32
    %c0_i32_0 = arith.constant 0 : i32
    %c0_i32_1 = arith.constant 0 : i32
    return %c0_i32, %c0_i32_0 : i32, i32
  }
  func.func @transform_2(%arg0: i32) -> (i32, i32) {
    %c0_i32 = arith.constant 0 : i32
    %c0_i32_0 = arith.constant 0 : i32
    return %arg0, %c0_i32 : i32, i32
  }
}

</mosaic_0001>

<bundles_post_ra>
// kernel: embed.1
= control target key start
LH: loop header
LB: loop body
LE: loop exit
PB: predicated region body
PF: predicated region fallthrough
CT: control target
= control target key end

     0   :  { %7 = vsyncpa [#allocation3], 0  ;;  %s2042_s0 = inlined_call_operand.vmem [shape: s32[16,1], index: 0, kind: input, shape index: {}]   ;;  %s2043_s1 = inlined_call_operand.hbm [shape: f32[128,72], index: 1, kind: input, shape index: {}]   ;;  %s2044_s2 = inlined_call_operand.hbm [shape: f32[16,72], index: 2, kind: output, shape index: {}]  }
   0x1   :  { %8 = vsyncpa [#allocation4], 0 }
   0x2   :  { %10 = vsyncpa [#allocation4 + $0x1], 0  ;;  %s1588_s9 = smov 0   ;;  %s1590_s10 = smov 0  }
   0x3   :  { %s1592_s11 = smov 0   ;;  %s1594_s12 = smov 0  }
   0x4 LB: > { %s1609_s13 = sadd.s32 4294967295, %s1562_s12   ;;  %s927_s14 = sadd.s32 4294967294, %s1562_s12   ;;  %s1562_s12 = sphi %s1594_s12, %s2063_s12   ;;  %s1558_s11 = sphi %s1592_s11, %s2062_s11   ;;  %s1554_s10 = sphi %s1590_s10, %s2061_s10   ;;  %s1550_s9 = sphi %s1588_s9, %s2060_s9  }
   0x5   : > { %s1613_s15 = sadd.s32 1, %s1562_s12   ;;  %s70_s16 = sadd.s32 1, %s1558_s11 }
   0x6   : > { %s67_s17 = ssub.s32 %s1562_s12, %s1613_s15  ;;  %p80_p0 = scmp.ne.s32.totalorder %s1558_s11, %s1554_s10 }
   0x7   : > { %p68_p1 = scmp.eq.s32.totalorder %s67_s17, 0  ;;  %p81_p2 = scmp.eq.s32.totalorder %s1609_s13, 1 }
   0x8   : > { %p86_p3 = scmp.ne.s32.totalorder %s1554_s10, %s1550_s9  ;;  %p87_p4 = scmp.eq.s32.totalorder %s927_s14, 1 }
   0x9   : > { %s1624_s18 = scalar_select %p68_p1, %s1558_s11, %s70_s16  }
   0xa   : > { %p1626_p5 = por %p81_p2, %p80_p0  ;;  %p1630_p6 = por %p87_p4, %p86_p3 }
   0xb   : > { %p928_p7 = scmp.ge.s32.totalorder %s1562_s12, 1  ;;  %p94_p8 = scmp.lt.s32.totalorder %s1562_s12, 3 }
   0xc   : > { %s2048_s19 = scalar_select %p1626_p5, 1, 0 }
   0xd   : > { %s2049_s20 = scalar_select %p1630_p6, 1, 0 }
   0xe   : > { %p2045_p9 = scmp.eq.s32.totalorder %s1609_s13, 0  ;;  %p1637_p10 = pnand %p928_p7, %p94_p8 }
   0xf   : > { %s1564_s22 = smov [#allocation2]   ;;  %s1468_s27 = scalar_lea.hbm %s2043_s1, 2048 }
  0x10   : > { %s2050_s21 = scalar_select %p1637_p10, 1, 0 }
  0x11   : > { %s106_s23 = sshll.u32 %s1564_s22, 4  ;;  %p1416_p11 = pneg %p1637_p10  ;;  %s107_s23 = int_to_ptr.vmem [resolvable:$true] %s106_s23 }
  0x12   : > { %p1469_p13 = scmp.ne.s32.totalorder %s2043_s1, %s1468_s27  ;;  %p1475_p3 = scmp.lt.u32.totalorder %s1468_s27, %s2043_s1 }
  0x13   : > { %p1645_p12 = pnand %p2045_p9, %p1416_p11 }
  0x15   : > { %p1470_p0 = pneg %p1645_p12 }
  0x17   : > { %p1471_p1 = pnand %p1470_p0, %p1469_p13 }
  0x19   : > { %p1472_p2 = pneg %p1471_p1 }
  0x1b   : > { %p1477_p4 = pnand %p1475_p3, %p1472_p2 }
  0x1d   : > { %1480 = shalt.err (!%p1477_p4)
}
  0x1e   : > { %s1481_s4 = scalar_lea.vmem %s107_s23, 2048  ;;  %p1489_p9 = scmp.lt.s32.totalorder %s107_s23, %s107_s23 }
  0x1f   : > { %p1482_p7 = scmp.ne.s32.totalorder %s107_s23, %s1481_s4  ;;  %p1490_p6 = scmp.lt.s32.totalorder %s1481_s4, %s1481_s4 }
  0x21   : > { %p1484_p8 = pnand %p1482_p7, %p1470_p0  ;;  %p1491_p5 = por %p1490_p6, %p1489_p9 }
  0x23   : > { %p1485_p11 = pneg %p1484_p8 }
  0x25   : > { %p1492_p10 = pnand %p1491_p5, %p1485_p11 }
  0x27   : > { %1495 = shalt.err (!%p1492_p10)
}
  0x28   : > { %s1565_s5 = smov 128   ;;  %s1566_s6 = smov 8  }
  0x29   : > { %1419 = dma.hbm_to_vmem [thread:$0]  (!%p1645_p12), %s2043_s1, 2048, %s107_s23, [#allocation3], %s1565_s5, %s1565_s5, %s1566_s6  }
  0x2a   : > { %p2052_p13 = scmp.ne.s32.totalorder %s2050_s21, 0 }
  0x2b   : > { %p2053_p1 = scmp.eq.s32.totalorder (!%p2052_p13), %s1609_s13, 0 }
  0x2c   : > { %129 = sbr.rel (%p2052_p13) target bundleno = 490 (0x1ea), region = 28 }
  0x33   : > { %1541 = dma.done.wait (%p2053_p1), [#allocation3], 2048   ;;  %p2054_p0 = pmov %p2053_p1 }
  0x34   : > { %p150_p5 = scmp.lt.s32.totalorder %s1609_s13, 1  ;;  %v1567_v0 = vmov 0   ;;  %v1568_v1 = vmov 0.0|0.0   ;;  %v183_v3 = vld [vmem:[#allocation2] sm:$0xff]  ;;  %v184_v4 = vld [vmem:[#allocation2 + $0x8] sm:$0xff]  ;;  %v185_v7 = vld [vmem:[#allocation2 + $0x10] sm:$0xff] }
  0x35   : > { %1543 = vsyncadd (%p2054_p0), [#allocation3], 4294965248  ;;  %1467 = vset.pattern.permute.xlu0 %v1567_v0  ;;  %1329 = vmatprep.subr.bf16.mxu0 %v1568_v1  ;;  %v200_v5 = vand.u32 4294901760, %v183_v3  ;;  %v203_v6 = vand.u32 4294901760, %v184_v4  ;;  %v186_v8 = vld [vmem:[#allocation2 + $0x18] sm:$0xff]  ;;  %v187_v9 = vld [vmem:[#allocation2 + $0x20] sm:$0xff] }
  0x36   : > { %s151_s14 = scalar_select %p150_p5, %s1609_s13, 1  ;;  %1257 = vmatprep.subr.bf16.mxu1 %v1568_v1  ;;  %v206_v10 = vand.u32 4294901760, %v185_v7  ;;  %v209_v11 = vand.u32 4294901760, %v186_v8  ;;  %v188_v12 = vld [vmem:[#allocation2 + $0x28] sm:$0xff]  ;;  %v212_v13 = vand.u32 4294901760, %v187_v9  ;;  %v189_v14 = vld [vmem:[#allocation2 + $0x30] sm:$0xff] }
  0x37   : > { %v190_v15 = vld [vmem:[#allocation2 + $0x38] sm:$0xff]  ;;  %v1678_v16 = vpack.c.bf16 %v203_v6, %v200_v5  ;;  %v1680_v17 = vsub.f32 %v183_v3, %v200_v5  ;;  %v1682_v18 = vsub.f32 %v184_v4, %v203_v6  ;;  %v215_v19 = vand.u32 4294901760, %v188_v12  ;;  %v1684_v20 = vld [vmem:[#allocation2 + $0x40] sm:$0xff]  ;;  %v1686_v21 = vld [vmem:[#allocation2 + $0x48] sm:$0xff]  ;;  %s935_s23 = sshll.u32 %s1609_s13, 3  ;;  %s147_s24 = sand.u32 1, %s1554_s10  }
  0x38   : > { %s934_s16 = sshll.u32 %s151_s14, 3  ;;  %v1688_v22 = vld [vmem:[#allocation2 + $0x50] sm:$0xff]  ;;  %v1690_v23 = vsub.f32 %v185_v7, %v206_v10  ;;  %v1692_v24 = vsub.f32 %v186_v8, %v209_v11  ;;  %v1694_v25 = vsub.f32 %v187_v9, %v212_v13  ;;  %v1696_v26 = vld [vmem:[#allocation2 + $0x58] sm:$0xff]  ;;  %v1698_v27 = vld [vmem:[#allocation2 + $0x60] sm:$0xff]  ;;  %v1702_v28 = vpack.c.bf16 %v209_v11, %v206_v10  ;;  %s933_s25 = sshll.u32 %s147_s24, 3 }
  0x39   : > { %s153_s22 = scalar_lea.vmem %s2042_s0, %s934_s16  ;;  %1331 = vmatpush3.bf16.msra.mxu0 %v1678_v16  ;;  %1259 = vmatpush3.bf16.msra.mxu1 %v1678_v16  ;;  %v1704_v29 = vsub.f32 %v188_v12, %v215_v19  ;;  %v218_v30 = vand.u32 4294901760, %v189_v14  ;;  %v221_v31 = vand.u32 4294901760, %v190_v15  ;;  %v224_v32 = vand.u32 4294901760, %v1684_v20  ;;  %v1711_v35 = vld [vmem:[#allocation2 + $0x68] sm:$0xff]  ;;  %v1719_v40 = vld [vmem:[#allocation2 + $0x70] sm:$0xff]  ;;  %v1721_v41 = vld [vmem:[#allocation2 + $0x78] sm:$0xff] }
  0x3a   : > { %v154_v2 = vld [vmem:[%s153_s22] sm:$0xff]  ;;  %1332 = vmatprep.subr.bf16.mxu0 %v1568_v1  ;;  %1260 = vmatprep.subr.bf16.mxu1 %v1568_v1  ;;  %v227_v33 = vand.u32 4294901760, %v1686_v21  ;;  %v230_v34 = vand.u32 4294901760, %v1688_v22  ;;  %v233_v38 = vand.u32 4294901760, %v1696_v26  ;;  %v236_v39 = vand.u32 4294901760, %v1698_v27  ;;  %s942_s26 = sshll.u32 %s1609_s13, 7 }
  0x3b   : > { %176 = vperm.xlu0 %1467, %v154_v2   ;;  %v1713_v36 = vsub.f32 %v189_v14, %v218_v30  ;;  %v1715_v37 = vsub.f32 %v190_v15, %v221_v31  ;;  %v1723_v42 = vpack.c.bf16 %v215_v19, %v212_v13  ;;  %v1726_v43 = vsub.f32 %v1684_v20, %v224_v32  ;;  %s149_s27 = scalar_lea.vmem [#allocation5], %s933_s25  ;;  %s2000_s3 = scalar_lea.hbm %s2044_s2, %s942_s26 }
  0x3c   : > { %v1729_v44 = vsub.f32 %v1686_v21, %v227_v33  ;;  %v1734_v45 = vsub.f32 %v1688_v22, %v230_v34  ;;  %v1737_v46 = vsub.f32 %v1696_v26, %v233_v38  ;;  %v239_v47 = vand.u32 4294901760, %v1711_v35  ;;  %s856_s28 = sshll.u32 %s149_s27, 4  ;;  %s843_s4 = scalar_lea.sflag [#allocation4], %s147_s24  ;;  %s2002_s28 = int_to_ptr.vmem [resolvable:$true] %s856_s28 }
  0x3d   : > { %1334 = vmatpush3.bf16.msra.mxu0 %v1702_v28  ;;  %1262 = vmatpush3.bf16.msra.mxu1 %v1702_v28  ;;  %v1743_v48 = vsub.f32 %v1698_v27, %v236_v39  ;;  %v242_v49 = vand.u32 4294901760, %v1719_v40  ;;  %v245_v50 = vand.u32 4294901760, %v1721_v41  ;;  %vm1569_vm0 = vmmov 0   ;;  %s1496_s5 = scalar_lea.vmem %s2002_s28, 128  ;;  %p2058_p9 = scmp.ne.s32.totalorder %s2048_s19, 0 }
  0x3e   : > { %1335 = vmatprep.subr.bf16.mxu0 %v1568_v1  ;;  %1263 = vmatprep.subr.bf16.mxu1 %v1568_v1  ;;  %v1752_v51 = vsub.f32 %v1711_v35, %v239_v47  ;;  %v1570_v52 = vmov 0.0   ;;  %v293_v53 = vand.u32 4294901760, %v1680_v17  ;;  %v300_v54 = vand.u32 4294901760, %v1682_v18  ;;  %p1497_p6 = scmp.ne.s32.totalorder %s2002_s28, %s1496_s5  ;;  %s1572_s13 = smov [#allocation5]  }
  0x3f   : > { %1184 = vmatprep.mubr.msk.f32.mxu0 %vm1569_vm0, %v1570_v52  ;;  %1079 = vmatprep.mubr.msk.f32.mxu1 %vm1569_vm0, %v1570_v52  ;;  %v1760_v55 = vpack.c.bf16 %v221_v31, %v218_v30  ;;  %v1765_v56 = vsub.f32 %v1719_v40, %v242_v49  ;;  %v1770_v57 = vsub.f32 %v1721_v41, %v245_v50  ;;  %v307_v61 = vand.u32 4294901760, %v1690_v23  ;;  %s1500_s6 = sshll.u32 %s1572_s13, 4  ;;  %s1501_s6 = int_to_ptr.vmem [resolvable:$false] %s1500_s6 }
  0x40   : > { %v1774_v58 = vpack.c.bf16 %v300_v54, %v293_v53  ;;  %v294_v59 = vsub.f32 %v1680_v17, %v293_v53  ;;  %v301_v60 = vsub.f32 %v1682_v18, %v300_v54  ;;  %v314_v62 = vand.u32 4294901760, %v1692_v24  ;;  %p1498_p10 = pnand %p1497_p6, %p2058_p9  ;;  %s1502_s7 = scalar_lea.vmem %s1501_s6, 256 }
  0x41   : > { %1337 = vmatpush3.bf16.msra.mxu0 %v1723_v42  ;;  %1265 = vmatpush3.bf16.msra.mxu1 %v1723_v42  ;;  %v321_v63 = vand.u32 4294901760, %v1694_v25  ;;  %v328_v0 = vand.u32 4294901760, %v1704_v29  ;;  %v308_v5 = vsub.f32 %v1690_v23, %v307_v61  ;;  %v1790_v7 = vpack.c.bf16 %v227_v33, %v224_v32  ;;  %p1503_p2 = scmp.lt.s32.totalorder %s2002_s28, %s1501_s6  ;;  %p1504_p3 = scmp.lt.s32.totalorder %s1502_s7, %s1496_s5 }
  0x42   : > { %1338 = vmatprep.subr.bf16.mxu0 %v1568_v1  ;;  %1266 = vmatprep.subr.bf16.mxu1 %v1568_v1  ;;  %v295_v2 = vand.u32 4294901760, %v294_v59  ;;  %v302_v3 = vand.u32 4294901760, %v301_v60  ;;  %v1784_v4 = vpack.c.bf16 %v314_v62, %v307_v61  ;;  %v315_v6 = vsub.f32 %v1692_v24, %v314_v62  ;;  %p1499_p12 = pneg %p1498_p10 }
  0x43   : > { %v1792_v8 = vpack.c.bf16 %v328_v0, %v321_v63  ;;  %v322_v9 = vsub.f32 %v1694_v25, %v321_v63  ;;  %v335_v10 = vand.u32 4294901760, %v1713_v36  ;;  %v309_v12 = vand.u32 4294901760, %v308_v5  ;;  %p1505_p4 = por %p1504_p3, %p1503_p2 }
  0x44   : > { %v1798_v11 = vpack.c.bf16 %v302_v3, %v295_v2  ;;  %v316_v13 = vand.u32 4294901760, %v315_v6  ;;  %v329_v15 = vsub.f32 %v1704_v29, %v328_v0  ;;  %v342_v19 = vand.u32 4294901760, %v1715_v37 }
  0x45   : > { %1340 = vmatpush3.bf16.msra.mxu0 %v1760_v55  ;;  %1268 = vmatpush3.bf16.msra.mxu1 %v1760_v55  ;;  %v323_v14 = vand.u32 4294901760, %v322_v9  ;;  %v336_v20 = vsub.f32 %v1713_v36, %v335_v10  ;;  %v1803_v21 = vpack.c.bf16 %v233_v38, %v230_v34  ;;  %v349_v33 = vand.u32 4294901760, %v1726_v43  ;;  %p1506_p7 = pnand %p1505_p4, %p1499_p12 }
  0x46   : > { %1341 = vmatprep.subr.bf16.mxu0 %v1568_v1  ;;  %1269 = vmatprep.subr.bf16.mxu1 %v1568_v1  ;;  %v1805_v22 = vpack.c.bf16 %v316_v13, %v309_v12  ;;  %v330_v26 = vand.u32 4294901760, %v329_v15  ;;  %v1809_v30 = vpack.c.bf16 %v342_v19, %v335_v10  ;;  %v343_v32 = vsub.f32 %v1715_v37, %v342_v19 }
  0x47   : > { %v337_v31 = vand.u32 4294901760, %v336_v20  ;;  %v356_v34 = vand.u32 4294901760, %v1729_v44  ;;  %v350_v59 = vsub.f32 %v1726_v43, %v349_v33  ;;  %v1828_v61 = vpack.c.bf16 %v239_v47, %v236_v39 }
  0x48   : > { %v1816_v38 = vpack.c.bf16 %v330_v26, %v323_v14  ;;  %v344_v53 = vand.u32 4294901760, %v343_v32  ;;  %v363_v63 = vand.u32 4294901760, %v1734_v45  ;;  %v370_v0 = vand.u32 4294901760, %v1737_v46 }
  0x49   : > { %1343 = vmatpush3.bf16.msra.mxu0 %v1790_v7  ;;  %1271 = vmatpush3.bf16.msra.mxu1 %v1790_v7  ;;  %v1818_v54 = vpack.c.bf16 %v356_v34, %v349_v33  ;;  %v357_v60 = vsub.f32 %v1729_v44, %v356_v34  ;;  %v351_v2 = vand.u32 4294901760, %v350_v59  ;;  %v1844_v39 = vpack.c.bf16 %v245_v50, %v242_v49 }
  0x4a   : > { %1344 = vmatprep.subr.bf16.mxu0 %v1568_v1  ;;  %1272 = vmatprep.subr.bf16.mxu1 %v1568_v1  ;;  %v1830_v62 = vpack.c.bf16 %v344_v53, %v337_v31  ;;  %v1836_v5 = vpack.c.bf16 %v370_v0, %v363_v63  ;;  %v364_v27 = vsub.f32 %v1734_v45, %v363_v63  ;;  %v377_v10 = vand.u32 4294901760, %v1743_v48 }
  0x4b   : > { %v358_v3 = vand.u32 4294901760, %v357_v60  ;;  %v371_v35 = vsub.f32 %v1737_v46, %v370_v0  ;;  %v384_v12 = vand.u32 4294901760, %v1752_v51  ;;  %v391_v15 = vand.u32 4294901760, %v1765_v56 }
  0x4c   : > { %v365_v6 = vand.u32 4294901760, %v364_v27  ;;  %v378_v49 = vsub.f32 %v1743_v48, %v377_v10  ;;  %v398_v19 = vand.u32 4294901760, %v1770_v57  ;;  %v1306_v59 = vpack.c.bf16 %v1682_v18, %v1680_v17 }
  0x4d   : > { %1346 = vmatpush3.bf16.msra.mxu0 %v1803_v21  ;;  %1274 = vmatpush3.bf16.msra.mxu1 %v1803_v21  ;;  %v1846_v47 = vpack.c.bf16 %v358_v3, %v351_v2  ;;  %v372_v9 = vand.u32 4294901760, %v371_v35  ;;  %v1856_v41 = vpack.c.bf16 %v384_v12, %v377_v10  ;;  %v385_v50 = vsub.f32 %v1752_v51, %v384_v12 }
  0x4e   : > { %1347 = vmatprep.subr.bf16.mxu0 %v1568_v1  ;;  %1275 = vmatprep.subr.bf16.mxu1 %v1568_v1  ;;  %v379_v13 = vand.u32 4294901760, %v378_v49  ;;  %v1868_v26 = vpack.c.bf16 %v398_v19, %v391_v15  ;;  %v392_v31 = vsub.f32 %v1765_v56, %v391_v15  ;;  %v399_v32 = vsub.f32 %v1770_v57, %v398_v19 }
  0x4f   : > { %v1854_v40 = vpack.c.bf16 %v372_v9, %v365_v6  ;;  %v386_v14 = vand.u32 4294901760, %v385_v50  ;;  %v1309_v60 = vpack.c.bf16 %v1692_v24, %v1690_v23  ;;  %v1312_v63 = vpack.c.bf16 %v1704_v29, %v1694_v25 }
  0x50   : > { %v393_v33 = vand.u32 4294901760, %v392_v31  ;;  %v400_v34 = vand.u32 4294901760, %v399_v32  ;;  %v1315_v0 = vpack.c.bf16 %v1715_v37, %v1713_v36  ;;  %v1318_v2 = vpack.c.bf16 %v1729_v44, %v1726_v43 }
  0x51   : > { %1349 = vmatpush3.bf16.msra.mxu0 %v1828_v61  ;;  %1277 = vmatpush3.bf16.msra.mxu1 %v1828_v61  ;;  %v1866_v20 = vpack.c.bf16 %v386_v14, %v379_v13  ;;  %v1321_v3 = vpack.c.bf16 %v1737_v46, %v1734_v45  ;;  %v1324_v27 = vpack.c.bf16 %v1752_v51, %v1743_v48  ;;  %v156_v6 = vlaneseq }
  0x52   : > { %1350 = vmatprep.subr.bf16.mxu0 %v1568_v1  ;;  %1278 = vmatprep.subr.bf16.mxu1 %v1568_v1  ;;  %v1872_v53 = vpack.c.bf16 %v400_v34, %v393_v33  ;;  %v160_v10 = vstv %s935_s23  ;;  %vm840_vm8 = vcmask 588800  }
  0x53   : > { %v159_v9 = vshrl.u32 %v156_v6, 7  ;;  %v157_v32 = vand.u32 127, %v156_v6 }
  0x55   : > { %1352 = vmatpush3.bf16.msra.mxu0 %v1844_v39  ;;  %1280 = vmatpush3.bf16.msra.mxu1 %v1844_v39  ;;  %v161_v12 = vadd.s32 %v160_v10, %v159_v9 }
  0x56   : > { %1353 = vmatprep.subr.bf16.mxu0 %v1568_v1  ;;  %1281 = vmatprep.subr.bf16.mxu1 %v1568_v1 }
  0x57   : > { %v163_v49 = vsub.s32 0, %v161_v12  ;;  %vm162_vm1 = vcmp.lt.s32.totalorder %v161_v12, 0 }
  0x59   : > { %v936_v50 = vmin.u32 %v163_v49, %v161_v12 }
  0x5b   : > { %v166_v13 = vand.u32 7, %v936_v50 }
  0x5d   : > { %v167_v14 = vsub.s32 0, %v166_v13 }
  0x5f   : > { %v168_v15 = vsel %vm162_vm1, %v167_v14, %v166_v13 }
  0x60   : > { %vm169_vm2 = vcmp.ne.s32.totalorder %v168_v15, 0  ;;  %vm170_vm3 = vcmp.lt.s32.totalorder %v168_v15, 0  ;;  %v172_v19 = vadd.s32 8, %v168_v15 }
  0x61   : > { %vm171_vm4 = vmand %vm170_vm3, %vm169_vm2 }
  0x62   : > { %v173_v31 = vsel %vm171_vm4, %v172_v19, %v168_v15 }
  0x63   : > { %v174_v33 = vadd.s32 65, %v173_v31 }
  0x65   : > { %vm179_vm5 = vcmp.eq.s32.totalorder %v157_v32, %v174_v33 }
  0xba   : > { %v177_v34 = vpop.permute.xlu0 %176 }
  0xbb   : > { %vm178_vm6 = vcmp.eq.s32.totalorder %v157_v32, %v177_v34 }
  0xbc   : > { %vm1891_vm7 = vmor %vm178_vm6, %vm179_vm5 }
  0xbd   : > { %v937_v9 = vsel %vm1891_vm7, 1.0, %v1570_v52 }
  0xbe   : > { %v1898_v10 = vsub.f32 %v937_v9, %v937_v9 }
  0xc0   : > { %v282_v12 = vand.u32 4294901760, %v1898_v10 }
  0xc2   : > { %1185 = vmatmul.mubr.f32.vlgmr.msra.gmra.mrb[0].mxu0 %v282_v12  ;;  %v283_v49 = vsub.f32 %v1898_v10, %v282_v12 }
  0xc3   : > { %1355 = vmatpush3.bf16.msra.mxu0 %v1774_v58  ;;  %1219 = vmatprep.mubr.msk.f32.mxu0 %vm1569_vm0, %v1570_v52  ;;  %v1571_v58 = vmov 1.0  }
  0xc4   : > { %1356 = vmatprep.subr.bf16.mxu0 %v1568_v1  ;;  %v284_v6 = vand.u32 4294901760, %v283_v49 }
  0xc6   : > { %1080 = vmatmul.mubr.f32.vlgmr.msra.gmra.mrb[0].mxu1 %v284_v6 }
  0xc7   : > { %1283 = vmatpush3.bf16.msra.mxu1 %v1798_v11  ;;  %1358 = vmatpush3.bf16.msra.mxu0 %v1784_v4 }
  0xc8   : > { %1284 = vmatprep.subr.bf16.mxu1 %v1568_v1  ;;  %1359 = vmatprep.subr.bf16.mxu0 %v1568_v1 }
  0xc9   : > { %1114 = vmatprep.mubr.msk.f32.mxu1 %vm1569_vm0, %v1570_v52 }
  0xcb   : > { %1286 = vmatpush3.bf16.msra.mxu1 %v1805_v22  ;;  %1361 = vmatpush3.bf16.msra.mxu0 %v1792_v8 }
  0xcc   : > { %1287 = vmatprep.subr.bf16.mxu1 %v1568_v1  ;;  %1362 = vmatprep.subr.bf16.mxu0 %v1568_v1 }
  0xcf   : > { %1289 = vmatpush3.bf16.msra.mxu1 %v1816_v38  ;;  %1364 = vmatpush3.bf16.msra.mxu0 %v1809_v30 }
  0xd0   : > { %1290 = vmatprep.subr.bf16.mxu1 %v1568_v1  ;;  %1365 = vmatprep.subr.bf16.mxu0 %v1568_v1 }
  0xd3   : > { %1292 = vmatpush3.bf16.msra.mxu1 %v1830_v62  ;;  %1367 = vmatpush3.bf16.msra.mxu0 %v1818_v54 }
  0xd4   : > { %1293 = vmatprep.subr.bf16.mxu1 %v1568_v1  ;;  %1368 = vmatprep.subr.bf16.mxu0 %v1568_v1 }
  0xd7   : > { %1295 = vmatpush3.bf16.msra.mxu1 %v1846_v47  ;;  %1370 = vmatpush3.bf16.msra.mxu0 %v1836_v5 }
  0xd8   : > { %1296 = vmatprep.subr.bf16.mxu1 %v1568_v1  ;;  %1371 = vmatprep.subr.bf16.mxu0 %v1568_v1 }
  0xdb   : > { %1298 = vmatpush3.bf16.msra.mxu1 %v1854_v40  ;;  %1373 = vmatpush3.bf16.msra.mxu0 %v1856_v41 }
  0xdc   : > { %1299 = vmatprep.subr.bf16.mxu1 %v1568_v1  ;;  %1374 = vmatprep.subr.bf16.mxu0 %v1568_v1 }
  0xdf   : > { %1301 = vmatpush3.bf16.msra.mxu1 %v1866_v20  ;;  %1376 = vmatpush3.bf16.msra.mxu0 %v1868_v26 }
  0xe0   : > { %1302 = vmatprep.subr.bf16.mxu1 %v1568_v1  ;;  %1377 = vmatprep.subr.bf16.mxu0 %v1568_v1 }
  0xe2   : > { %1220 = vmatmul.mubr.msk.f32.vlgmr.msra.gmra.mrb[0].mxu0 %vm1891_vm7, %v1571_v58 }
  0xe3   : > { %1304 = vmatpush3.bf16.msra.mxu1 %v1872_v53  ;;  %1379 = vmatpush3.bf16.msra.mxu0 %v1678_v16  ;;  %v2057_v16 = vpack.c.bf16 %v1770_v57, %v1765_v56 }
  0xe4   : > { %1305 = vmatprep.subr.bf16.mxu1 %v1568_v1  ;;  %1380 = vmatprep.subr.bf16.mxu0 %v1568_v1 }
  0xe5   : > { %1254 = vmatprep.mubr.msk.f32.mxu0 %vm1569_vm0, %v1570_v52 }
  0xe6   : > { %1115 = vmatmul.mubr.msk.f32.vlgmr.msra.gmra.mrb[0].mxu1 %vm1891_vm7, %v1571_v58 }
  0xe7   : > { %1307 = vmatpush3.bf16.msra.mxu1 %v1306_v59  ;;  %1382 = vmatpush3.bf16.msra.mxu0 %v1702_v28 }
  0xe8   : > { %1308 = vmatprep.subr.bf16.mxu1 %v1568_v1  ;;  %1383 = vmatprep.subr.bf16.mxu0 %v1568_v1 }
  0xe9   : > { %1149 = vmatprep.mubr.msk.f32.mxu1 %vm1569_vm0, %v1570_v52 }
  0xeb   : > { %1310 = vmatpush3.bf16.msra.mxu1 %v1309_v60  ;;  %1385 = vmatpush3.bf16.msra.mxu0 %v1723_v42 }
  0xec   : > { %1311 = vmatprep.subr.bf16.mxu1 %v1568_v1  ;;  %1386 = vmatprep.subr.bf16.mxu0 %v1568_v1 }
  0xef   : > { %1313 = vmatpush3.bf16.msra.mxu1 %v1312_v63  ;;  %1388 = vmatpush3.bf16.msra.mxu0 %v1760_v55 }
  0xf0   : > { %1314 = vmatprep.subr.bf16.mxu1 %v1568_v1  ;;  %1389 = vmatprep.subr.bf16.mxu0 %v1568_v1 }
  0xf3   : > { %1316 = vmatpush3.bf16.msra.mxu1 %v1315_v0  ;;  %1391 = vmatpush3.bf16.msra.mxu0 %v1790_v7 }
  0xf4   : > { %1317 = vmatprep.subr.bf16.mxu1 %v1568_v1  ;;  %1392 = vmatprep.subr.bf16.mxu0 %v1568_v1 }
  0xf7   : > { %1319 = vmatpush3.bf16.msra.mxu1 %v1318_v2  ;;  %1394 = vmatpush3.bf16.msra.mxu0 %v1803_v21 }
  0xf8   : > { %1320 = vmatprep.subr.bf16.mxu1 %v1568_v1  ;;  %1395 = vmatprep.subr.bf16.mxu0 %v1568_v1 }
  0xfb   : > { %1322 = vmatpush3.bf16.msra.mxu1 %v1321_v3  ;;  %1397 = vmatpush3.bf16.msra.mxu0 %v1828_v61 }
  0xfc   : > { %1323 = vmatprep.subr.bf16.mxu1 %v1568_v1  ;;  %1398 = vmatprep.subr.bf16.mxu0 %v1568_v1 }
  0xff   : > { %1325 = vmatpush3.bf16.msra.mxu1 %v1324_v27  ;;  %1400 = vmatpush3.bf16.msra.mxu0 %v1844_v39 }
 0x100   : > { %1326 = vmatprep.subr.bf16.mxu1 %v1568_v1 }
 0x102   : > { %1255 = vmatmul.mubr.msk.f32.vlgmr.msra.gmra.mrb[0].mxu0 %vm1891_vm7, %v1571_v58 }
 0x103   : > { %1328 = vmatpush3.bf16.msra.mxu1 %v2057_v16 }
 0x106   : > { %1150 = vmatmul.mubr.f32.vlgmr.msra.gmra.mrb[0].mxu1 %v1898_v10 }
 0x1d5   : > { %v836_v17 = vpop.f32.mrb[0].mxu0 }
 0x1d6   : > { %v1256_v18 = vpop.f32.mrb[1].mxu0 }
 0x1d9   : > { %v541_v23 = vpop.f32.mrb[0].mxu1 }
 0x1da   : > { %v1401_v1 = vadd.f32 %v836_v17, %v541_v23  ;;  %v1151_v24 = vpop.f32.mrb[1].mxu1 }
 0x1dc   : > { %841 = vst.msk [vmem:[%s149_s27] sm:$0xff] %vm840_vm8, %v1401_v1 }
 0x1dd   : > { %1509 = shalt.err (!%p1506_p7)
}
 0x1de   : > { %s1510_s8 = scalar_lea.hbm %s2000_s3, 128  ;;  %s1514_s17 = scalar_lea.hbm %s2044_s2, 256 }
 0x1df   : > { %p1511_p8 = scmp.ne.s32.totalorder %s2000_s3, %s1510_s8  ;;  %p1515_p1 = scmp.lt.u32.totalorder %s2000_s3, %s2044_s2 }
 0x1e0   : > { %p1516_p0 = scmp.lt.u32.totalorder %s1514_s17, %s1510_s8  ;;  %p1518_p6 = scmp.lt.u32.totalorder %s1510_s8, %s2000_s3 }
 0x1e1   : > { %p1512_p11 = pnand %p1511_p8, %p2058_p9 }
 0x1e2   : > { %p1517_p5 = por %p1516_p0, %p1515_p1 }
 0x1e3   : > { %p1513_p13 = pneg %p1512_p11 }
 0x1e4   : > { %p1519_p10 = por %p1518_p6, %p1517_p5 }
 0x1e6   : > { %p1520_p12 = pnand %p1519_p10, %p1513_p13 }
 0x1e8   : > { %1523 = shalt.err (!%p1520_p12)
}
 0x1e9   : > { %1414 = dma.vmem_to_hbm [thread:$0]  (%p2058_p9), %s2002_s28, 128, %s2000_s3, %s843_s4  }
 0x1ea PF: > { %p1426_p2 = scmp.ge.s32.totalorder %s1562_s12, 2  ;;  %s868_s23 = sand.u32 1, %s1550_s9  }
 0x1eb   : > { %p2059_p3 = scmp.ne.s32.totalorder %s2049_s20, 0  ;;  %s869_s24 = scalar_lea.sflag [#allocation4], %s868_s23 }
 0x1ed   : > { %p1421_p4 = pnand %p1426_p2, %p2059_p3 }
 0x1ef   : > { %1545 = dma.done.wait (!%p1421_p4), %s869_s24, 128  }
 0x1f0   : > { %1547 = vsyncadd (!%p1421_p4), %s869_s24, 4294967168  ;;  %p13_p7 = scmp.ge.s32.totalorder %s1613_s15, 4   ;;  %s2060_s9 = smov %s1554_s10 }
 0x1f1   : > { %s2061_s10 = smov %s1558_s11  ;;  %s2062_s11 = smov %s1624_s18 }
 0x1f2   : > { %s2063_s12 = smov %s1613_s15  ;;  %15 = sbr.rel (!%p13_p7) target bundleno = 4 (0x4), region = 68 }
 0x1f9   :  { %874 = vsyncpa [#allocation3], 1 }
 0x1fa   :  { %876 = vsyncpa [#allocation3 + $0x1], 1 }
 0x1fb   :  { %877 = vsyncpa [#allocation4], 1 }
 0x1fc   :  { %879 = vsyncpa [#allocation4 + $0x1], 1 }

</bundles_post_ra>
